<compile_context>
chip_gen: v6e
topology: v6e:2x2x1
jax: 0.10.0
libtpu: 0.0.40
codegen_flags: <defaults>
</compile_context>

<pallas_src>
import jax
import jax.numpy as jnp
from jax import lax
from jax.experimental import pallas as pl
from jax.experimental.pallas import tpu as pltpu

_LANE = 128
_SUBLANE = 8
_VMEM_BUDGET = 22 * 1024 * 1024   # target padded, double-buffered footprint
_VMEM_LIMIT = 32 * 1024 * 1024    # scoped-VMEM limit requested from Mosaic
_TILE_N_CANDIDATES = (32768, 16384, 8192, 4096, 2048, 1024, 512, 256, 128)


def _ru(x, m):
    """Round x up to a multiple of m."""
    return ((x + m - 1) // m) * m


# ---------------------------------------------------------------------------
# Kernels
# ---------------------------------------------------------------------------

def _fc_kernel_t(feats_ref, w_ref, b_ref, xt_ref):
    """out_size == 1 path: xt[o, n] = sum_k w[o, k] * feats[n, k] + b[o].

    The row tile sits on the 128-lane axis -> unmasked, lane-dense stores.
    (Matrix-vector, HBM-bandwidth bound; MXU operand orientation is
    irrelevant here.)
    """
    acc = lax.dot_general(
        w_ref[...], feats_ref[...],
        dimension_numbers=(((1,), (1,)), ((), ())),
        preferred_element_type=jnp.float32,
    )                                                   # [out_size, tile_n] f32
    xt_ref[...] = (acc + b_ref[...]).astype(xt_ref.dtype)


def _fc_kernel_acc(feats_ref, wt_ref, b_ref, x_ref, acc_ref):
    """Natural layout: x[n, o] = sum_k feats[n, k] * w_t[k, o] + b[o].

    Canonical A[M,K] @ B[K,N] MXU contraction (weight pre-transposed once in
    the wrapper).  Grid = (row tiles, out tiles, K tiles); the f32 VMEM
    accumulator is carried across the (innermost) K axis.
    """
    k = pl.program_id(2)

    @pl.when(k == 0)
    def _():
        acc_ref[...] = jnp.zeros_like(acc_ref)

    acc_ref[...] += jnp.dot(feats_ref[...], wt_ref[...],
                            preferred_element_type=jnp.float32)

    @pl.when(k == pl.num_programs(2) - 1)
    def _():
        x_ref[...] = (acc_ref[...] + b_ref[...]).astype(x_ref.dtype)


# ---------------------------------------------------------------------------
# Layout-aware tile selection
# ---------------------------------------------------------------------------

def _pick_tile_n_transposed(n, in_size, out_size, itemsize):
    """Row tile for the out_size==1 transposed-output kernel."""
    resident = 2 * _ru(out_size, _SUBLANE) * _ru(in_size, _LANE) * itemsize   # W
    resident += 2 * _ru(out_size, _SUBLANE) * _LANE * itemsize                # b
    per_row = (2 * _ru(in_size, _LANE) * itemsize            # feats (x2 bufs)
               + 2 * _ru(out_size, _SUBLANE) * itemsize)     # x_t   (x2 bufs)
    remaining = _VMEM_BUDGET - resident
    n_cap = max(_ru(n, _LANE), _LANE)
    for t in _TILE_N_CANDIDATES:
        if t <= n_cap and t * per_row <= remaining:
            return t
    return _LANE


def _pick_tiles_natural(n, in_size, out_size, itemsize):
    """(tile_n, tile_k, tile_o) for the natural-layout accumulator kernel."""

    def w_bytes(tk, to):
        return 2 * _ru(tk, _SUBLANE) * _ru(to, _LANE) * itemsize

    # K tiling must divide in_size exactly: reduction-axis padding is not
    # masked by Pallas and would corrupt the accumulator.
    tk_opts = [in_size] + [t for t in (2048, 1024, 512, 256)
                           if t < in_size and in_size % t == 0]
    to_opts = [out_size] + [t for t in (1024, 512, 256) if t < out_size]

    tile_k = tile_o = None
    for to in to_opts:
        for tk in tk_opts:
            if w_bytes(tk, to) <= _VMEM_BUDGET // 3:
                tile_k, tile_o = tk, to
                break
        if tile_k is not None:
            break
    if tile_k is None:
        return None   # weight cannot be tiled into budget -> caller falls back

    resident = w_bytes(tile_k, tile_o)
    resident += 2 * _SUBLANE * _ru(tile_o, _LANE) * itemsize        # bias
    per_row = (2 * _ru(tile_k, _LANE) * itemsize     # feats (x2 bufs)
               + 2 * _ru(tile_o, _LANE) * itemsize   # x     (x2 bufs)
               + _ru(tile_o, _LANE) * 4)             # f32 accumulator scratch
    remaining = _VMEM_BUDGET - resident
    n_cap = max(_ru(n, _LANE), _LANE)
    tile_n = _LANE
    for t in _TILE_N_CANDIDATES:
        if t <= n_cap and t * per_row <= remaining:
            tile_n = t
            break
    return tile_n, tile_k, tile_o


# ---------------------------------------------------------------------------
# Wrapper
# ---------------------------------------------------------------------------

def fc_layer(feats, weight, bias, *, min_pallas_rows=256):
    """feats: [N, in_size], weight: [out_size, in_size], bias: [out_size].

    Returns (feats, x) with x = feats @ weight.T + bias, matching
    FCLayer.forward.
    """
    n, in_size = feats.shape
    out_size, in_size_w = weight.shape
    assert in_size == in_size_w and bias.shape == (out_size,)

    def _xla_fallback():
        x = (feats @ weight.T + bias.reshape(1, out_size)).astype(feats.dtype)
        return feats, x

    # MIL-scale bags: kernel launch / per-step / DMA overhead dwarfs the FLOPs.
    if n < min_pallas_rows:
        return _xla_fallback()

    itemsize = jnp.dtype(feats.dtype).itemsize
    cost = pl.CostEstimate(
        flops=2 * n * in_size * out_size,
        transcendentals=0,
        bytes_accessed=(n * in_size + out_size * in_size + out_size
                        + n * out_size) * itemsize,
    )

    # --- out_size == 1: transposed, lane-dense output (reshape back is free).
    if out_size == 1:
        w_resident = 2 * _ru(out_size, _SUBLANE) * _ru(in_size, _LANE) * itemsize
        if w_resident <= _VMEM_BUDGET // 3:
            tile_n = _pick_tile_n_transposed(n, in_size, out_size, itemsize)
            x_t = pl.pallas_call(
                _fc_kernel_t,
                out_shape=jax.ShapeDtypeStruct((out_size, n), feats.dtype),
                grid_spec=pltpu.PrefetchScalarGridSpec(
                    num_scalar_prefetch=0,
                    grid=(pl.cdiv(n, tile_n),),
                    in_specs=[
                        pl.BlockSpec((tile_n, in_size), lambda i: (i, 0)),
                        pl.BlockSpec((out_size, in_size), lambda i: (0, 0)),
                        pl.BlockSpec((out_size, 1), lambda i: (0, 0)),
                    ],
                    out_specs=pl.BlockSpec((out_size, tile_n), lambda i: (0, i)),
                ),
                compiler_params=pltpu.CompilerParams(
                    dimension_semantics=("parallel",),
                    vmem_limit_bytes=_VMEM_LIMIT,
                ),
                cost_estimate=cost,
            )(feats, weight, bias.reshape(out_size, 1))
            return feats, x_t.reshape(n, 1)

    # --- General path: natural [N, out_size] layout, optional out/K tiling.
    tiles = _pick_tiles_natural(n, in_size, out_size, itemsize)
    if tiles is None:
        # TODO(synk): weight too large to tile into VMEM with an evenly
        # dividing K tile; fall back to XLA rather than risking a VMEM OOM.
        return _xla_fallback()
    tile_n, tile_k, tile_o = tiles

    w_t = weight.T   # one-time [in_size, out_size]; canonical MXU operand order
    grid = (pl.cdiv(n, tile_n), pl.cdiv(out_size, tile_o), pl.cdiv(in_size, tile_k))
    x = pl.pallas_call(
        _fc_kernel_acc,
        out_shape=jax.ShapeDtypeStruct((n, out_size), feats.dtype),
        grid_spec=pltpu.PrefetchScalarGridSpec(
            num_scalar_prefetch=0,
            grid=grid,
            in_specs=[
                pl.BlockSpec((tile_n, tile_k), lambda i, j, k: (i, k)),
                pl.BlockSpec((tile_k, tile_o), lambda i, j, k: (k, j)),
                pl.BlockSpec((1, tile_o), lambda i, j, k: (0, j)),
            ],
            out_specs=pl.BlockSpec((tile_n, tile_o), lambda i, j, k: (i, j)),
            scratch_shapes=[pltpu.VMEM((tile_n, tile_o), jnp.float32)],
        ),
        compiler_params=pltpu.CompilerParams(
            dimension_semantics=("parallel", "parallel", "arbitrary"),
            vmem_limit_bytes=_VMEM_LIMIT,
        ),
        cost_estimate=cost,
    )(feats, w_t, bias.reshape(1, out_size))

    # FCLayer returns the unchanged input as the first output — no kernel
    # round-trip needed for it.
    return feats, x


if __name__ == "__main__":
    key = jax.random.PRNGKey(0)

    def init_linear(k, in_size, out_size):
        kw, kb = jax.random.split(k)
        bound = 1.0 / (in_size ** 0.5)
        w = jax.random.uniform(kw, (out_size, in_size),
                               minval=-bound, maxval=bound, dtype=jnp.float32)
        b = jax.random.uniform(kb, (out_size,),
                               minval=-bound, maxval=bound, dtype=jnp.float32)
        return w, b

    def check(n, in_size, out_size, k):
        kf, kp = jax.random.split(k)
        feats = jax.random.normal(kf, (n, in_size), dtype=jnp.float32)
        w, b = init_linear(kp, in_size, out_size)
        feats_out, x = fc_layer(feats, w, b)
        jax.block_until_ready((feats_out, x))
        x_ref = feats @ w.T + b
        assert feats_out.shape == (n, in_size)
        assert x.shape == (n, out_size)
        assert jnp.allclose(feats_out, feats)
        assert jnp.allclose(x, x_ref, atol=1e-4, rtol=1e-4), \
            float(jnp.max(jnp.abs(x - x_ref)))

    k1, k2, k3, k4 = jax.random.split(key, 4)
    # MIL default (out_size=1): transposed, lane-dense kernel.
    check(2048, 32, 1, k1)
    # Wide head (out_size=128): natural-orientation accumulator kernel.
    check(512, 32, 128, k2)
    # 2 <= out_size < 128 with a partial last row tile: masked stores,
    # no wrapper-side transpose.
    check(640, 48, 96, k3)
    # Tiny bag: size gate falls back to XLA's fused dot.
    check(8, 32, 1, k4)

    print("KERNEL_OK")
</pallas_src>

<mosaic_0001>
module attributes {stable_mosaic.version = 11 : i64} {
  func.func @_fc_kernel_t(%arg0: i32, %arg1: memref<2048x32xf32, #tpu.memory_space<vmem>>, %arg2: memref<1x32xf32, #tpu.memory_space<vmem>>, %arg3: memref<1x1xf32, #tpu.memory_space<vmem>>, %arg4: memref<1x2048xf32, #tpu.memory_space<vmem>>) attributes {dimension_semantics = [#tpu.dimension_semantics<parallel>], iteration_bounds = array<i64: 1>, scalar_prefetch = 0 : i64, scratch_operands = 0 : i64, tpu.core_type = #tpu.core_type<tc>, window_params = [{transform_indices = @transform_0, window_bounds = array<i64: 2048, 32>}, {pipeline_mode = #tpu.pipeline_mode<synchronous>, transform_indices = @transform_1, window_bounds = array<i64: 1, 32>}, {pipeline_mode = #tpu.pipeline_mode<synchronous>, transform_indices = @transform_2, window_bounds = array<i64: 1, 1>}, {transform_indices = @transform_3, window_bounds = array<i64: 1, 2048>}]} {
    %c0 = arith.constant 0 : index
    %c0_0 = arith.constant 0 : index
    %0 = vector.load %arg2[%c0, %c0_0] : memref<1x32xf32, #tpu.memory_space<vmem>>, vector<1x32xf32>
    %c0_1 = arith.constant 0 : index
    %c0_2 = arith.constant 0 : index
    %1 = vector.load %arg1[%c0_1, %c0_2] : memref<2048x32xf32, #tpu.memory_space<vmem>>, vector<2048x32xf32>
    %cst = arith.constant dense<0.000000e+00> : vector<1x2048xf32>
    %2 = tpu.matmul %0, %1, %cst {dimension_numbers = #tpu.dot_dimension_numbers<[1], [1], [0], [0], [0, 0, 1, 0], [], []>} : vector<1x32xf32>, vector<2048x32xf32>, vector<1x2048xf32> -> vector<1x2048xf32>
    %c0_3 = arith.constant 0 : index
    %c0_4 = arith.constant 0 : index
    %3 = vector.load %arg3[%c0_3, %c0_4] : memref<1x1xf32, #tpu.memory_space<vmem>>, vector<1x1xf32>
    %4 = vector.broadcast %3 : vector<1x1xf32> to vector<1x2048xf32>
    %5 = arith.addf %2, %4 : vector<1x2048xf32>
    %c0_5 = arith.constant 0 : index
    %c0_6 = arith.constant 0 : index
    %6 = vector.load %arg4[%c0_5, %c0_6] : memref<1x2048xf32, #tpu.memory_space<vmem>>, vector<1x2048xf32>
    tpu.vector_store %arg4[%c0_5, %c0_6], %5 {strides = array<i32>} : memref<1x2048xf32, #tpu.memory_space<vmem>>, vector<1x2048xf32>,
    return
  }
  func.func @transform_0(%arg0: i32) -> (i32, i32) {
    %c0_i32 = arith.constant 0 : i32
    %c0_i32_0 = arith.constant 0 : i32
    return %arg0, %c0_i32 : i32, i32
  }
  func.func @transform_1(%arg0: i32) -> (i32, i32) {
    %c0_i32 = arith.constant 0 : i32
    %c0_i32_0 = arith.constant 0 : i32
    %c0_i32_1 = arith.constant 0 : i32
    return %c0_i32, %c0_i32_0 : i32, i32
  }
  func.func @transform_2(%arg0: i32) -> (i32, i32) {
    %c0_i32 = arith.constant 0 : i32
    %c0_i32_0 = arith.constant 0 : i32
    %c0_i32_1 = arith.constant 0 : i32
    return %c0_i32, %c0_i32_0 : i32, i32
  }
  func.func @transform_3(%arg0: i32) -> (i32, i32) {
    %c0_i32 = arith.constant 0 : i32
    %c0_i32_0 = arith.constant 0 : i32
    return %c0_i32, %arg0 : i32, i32
  }
}

</mosaic_0001>

<bundles_post_ra>
// kernel: tpu_custom_call.1
= control target key start
LH: loop header
LB: loop body
LE: loop exit
PB: predicated region body
PF: predicated region fallthrough
CT: control target
= control target key end

     0   :  { %s3408_s0 = inlined_call_operand.vmem [shape: f32[2048,32], index: 0, kind: input, shape index: {}]   ;;  %s3409_s1 = inlined_call_operand.vmem [shape: f32[1,32], index: 1, kind: input, shape index: {}]   ;;  %s3410_s2 = inlined_call_operand.<no memory space> [shape: f32[1,1], index: 2, kind: input, shape index: {}]   ;;  %s3411_s3 = inlined_call_operand.hbm [shape: f32[1,2048], index: 3, kind: output, shape index: {}]  }
   0x1   :  { %v8_v0 = vstv %s3410_s2 }
   0x2   :  { %9 = vst [vmem:[#allocation2] sm:$0x1] %v8_v0 }
   0x3   :  { %v49_v1 = vld [vmem:[%s3408_s0 + $0xf8] sm:$0xff]  ;;  %vm284_vm0 = vcmask 261120   ;;  %v48_v5 = vld [vmem:[%s3408_s0 + $0xf0] sm:$0xff]  ;;  %v47_v9 = vld [vmem:[%s3408_s0 + $0xe8] sm:$0xff]  ;;  %v2318_v11 = vmov 0  }
   0x4   :  { %v81_v2 = vld [vmem:[%s3408_s0 + $0x1f8] sm:$0xff]  ;;  %2020 = vmatprep.subr.msk.mxu0 %vm284_vm0, %v49_v1  ;;  %v80_v6 = vld [vmem:[%s3408_s0 + $0x1f0] sm:$0xff]  ;;  %v79_v10 = vld [vmem:[%s3408_s0 + $0x1e8] sm:$0xff]  ;;  %2295 = vset.pattern.permute.xlu0 %v2318_v11 }
   0x5   :  { %v33_v3 = vld [vmem:[%s3408_s0 + $0x78] sm:$0xff]  ;;  %2054 = vmatprep.subr.msk.mxu1 %vm284_vm0, %v81_v2  ;;  %v32_v7 = vld [vmem:[%s3408_s0 + $0x70] sm:$0xff]  ;;  %v31_v12 = vld [vmem:[%s3408_s0 + $0x68] sm:$0xff] }
   0x6   :  { %v65_v4 = vld [vmem:[%s3408_s0 + $0x178] sm:$0xff]  ;;  %2021 = vmatpush3.xpose.msk.msra.mxu0 %vm284_vm0, %v33_v3  ;;  %v64_v8 = vld [vmem:[%s3408_s0 + $0x170] sm:$0xff]  ;;  %v63_v13 = vld [vmem:[%s3408_s0 + $0x168] sm:$0xff] }
   0x7   :  { %2055 = vmatpush3.xpose.msk.msra.mxu1 %vm284_vm0, %v65_v4  ;;  %2022 = vmatprep.subr.msk.mxu0 %vm284_vm0, %v48_v5  ;;  %v46_v14 = vld [vmem:[%s3408_s0 + $0xe0] sm:$0xff]  ;;  %v45_v18 = vld [vmem:[%s3408_s0 + $0xd8] sm:$0xff]  ;;  %v44_v22 = vld [vmem:[%s3408_s0 + $0xd0] sm:$0xff] }
   0x8   :  { %2056 = vmatprep.subr.msk.mxu1 %vm284_vm0, %v80_v6  ;;  %v78_v15 = vld [vmem:[%s3408_s0 + $0x1e0] sm:$0xff]  ;;  %v77_v19 = vld [vmem:[%s3408_s0 + $0x1d8] sm:$0xff]  ;;  %v76_v23 = vld [vmem:[%s3408_s0 + $0x1d0] sm:$0xff] }
   0x9   :  { %v30_v16 = vld [vmem:[%s3408_s0 + $0x60] sm:$0xff]  ;;  %v29_v20 = vld [vmem:[%s3408_s0 + $0x58] sm:$0xff]  ;;  %v28_v24 = vld [vmem:[%s3408_s0 + $0x50] sm:$0xff] }
   0xa   :  { %2023 = vmatpush3.xpose.msk.msra.mxu0 %vm284_vm0, %v32_v7  ;;  %v62_v17 = vld [vmem:[%s3408_s0 + $0x160] sm:$0xff]  ;;  %v61_v21 = vld [vmem:[%s3408_s0 + $0x158] sm:$0xff]  ;;  %v60_v25 = vld [vmem:[%s3408_s0 + $0x150] sm:$0xff] }
   0xb   :  { %2057 = vmatpush3.xpose.msk.msra.mxu1 %vm284_vm0, %v64_v8  ;;  %2024 = vmatprep.subr.msk.mxu0 %vm284_vm0, %v47_v9  ;;  %v43_v26 = vld [vmem:[%s3408_s0 + $0xc8] sm:$0xff]  ;;  %v2447_v28 = vld [vmem:[%s3409_s1] sm:$0x1]  ;;  %v41_v35 = vld [vmem:[%s3408_s0 + $0xb8] sm:$0xff] }
   0xc   :  { %2058 = vmatprep.subr.msk.mxu1 %vm284_vm0, %v79_v10  ;;  %v75_v27 = vld [vmem:[%s3408_s0 + $0x1c8] sm:$0xff]  ;;  %v42_v31 = vld [vmem:[%s3408_s0 + $0xc0] sm:$0xff]  ;;  %2052 = vmatprep.mubr.msk.f32.mxu0 %vm284_vm0, %v2447_v28  ;;  %v73_v36 = vld [vmem:[%s3408_s0 + $0x1b8] sm:$0xff] }
   0xd   :  { %v27_v29 = vld [vmem:[%s3408_s0 + $0x48] sm:$0xff]  ;;  %v74_v32 = vld [vmem:[%s3408_s0 + $0x1c0] sm:$0xff]  ;;  %2086 = vmatprep.mubr.msk.f32.mxu1 %vm284_vm0, %v2447_v28  ;;  %v25_v37 = vld [vmem:[%s3408_s0 + $0x38] sm:$0xff] }
   0xe   :  { %2025 = vmatpush3.xpose.msk.msra.mxu0 %vm284_vm0, %v31_v12  ;;  %v59_v30 = vld [vmem:[%s3408_s0 + $0x148] sm:$0xff]  ;;  %v26_v33 = vld [vmem:[%s3408_s0 + $0x40] sm:$0xff]  ;;  %v57_v38 = vld [vmem:[%s3408_s0 + $0x138] sm:$0xff] }
   0xf   :  { %2059 = vmatpush3.xpose.msk.msra.mxu1 %vm284_vm0, %v63_v13  ;;  %2026 = vmatprep.subr.msk.mxu0 %vm284_vm0, %v46_v14  ;;  %v58_v34 = vld [vmem:[%s3408_s0 + $0x140] sm:$0xff]  ;;  %v40_v39 = vld [vmem:[%s3408_s0 + $0xb0] sm:$0xff]  ;;  %v39_v43 = vld [vmem:[%s3408_s0 + $0xa8] sm:$0xff] }
  0x10   :  { %2060 = vmatprep.subr.msk.mxu1 %vm284_vm0, %v78_v15  ;;  %v72_v40 = vld [vmem:[%s3408_s0 + $0x1b0] sm:$0xff]  ;;  %v71_v44 = vld [vmem:[%s3408_s0 + $0x1a8] sm:$0xff]  ;;  %v38_v47 = vld [vmem:[%s3408_s0 + $0xa0] sm:$0xff] }
  0x11   :  { %v24_v41 = vld [vmem:[%s3408_s0 + $0x30] sm:$0xff]  ;;  %v23_v45 = vld [vmem:[%s3408_s0 + $0x28] sm:$0xff]  ;;  %v70_v48 = vld [vmem:[%s3408_s0 + $0x1a0] sm:$0xff] }
  0x12   :  { %2027 = vmatpush3.xpose.msk.msra.mxu0 %vm284_vm0, %v30_v16  ;;  %v56_v42 = vld [vmem:[%s3408_s0 + $0x130] sm:$0xff]  ;;  %v55_v46 = vld [vmem:[%s3408_s0 + $0x128] sm:$0xff]  ;;  %v22_v49 = vld [vmem:[%s3408_s0 + $0x20] sm:$0xff] }
  0x13   :  { %2061 = vmatpush3.xpose.msk.msra.mxu1 %vm284_vm0, %v62_v17  ;;  %2028 = vmatprep.subr.msk.mxu0 %vm284_vm0, %v45_v18  ;;  %v54_v50 = vld [vmem:[%s3408_s0 + $0x120] sm:$0xff]  ;;  %v37_v51 = vld [vmem:[%s3408_s0 + $0x98] sm:$0xff]  ;;  %v36_v56 = vld [vmem:[%s3408_s0 + $0x90] sm:$0xff] }
  0x14   :  { %2062 = vmatprep.subr.msk.mxu1 %vm284_vm0, %v77_v19  ;;  %v69_v52 = vld [vmem:[%s3408_s0 + $0x198] sm:$0xff]  ;;  %v274_v53 = vld [vmem:[#allocation2] sm:$0x1]  ;;  %v68_v57 = vld [vmem:[%s3408_s0 + $0x190] sm:$0xff] }
  0x15   :  { %277 = vperm.xlu0 %2295, %v274_v53   ;;  %v21_v54 = vld [vmem:[%s3408_s0 + $0x18] sm:$0xff]  ;;  %v20_v58 = vld [vmem:[%s3408_s0 + $0x10] sm:$0xff]  ;;  %v35_v60 = vld [vmem:[%s3408_s0 + $0x88] sm:$0xff] }
  0x16   :  { %2029 = vmatpush3.xpose.msk.msra.mxu0 %vm284_vm0, %v29_v20  ;;  %v53_v55 = vld [vmem:[%s3408_s0 + $0x118] sm:$0xff]  ;;  %v52_v59 = vld [vmem:[%s3408_s0 + $0x110] sm:$0xff]  ;;  %v67_v61 = vld [vmem:[%s3408_s0 + $0x188] sm:$0xff] }
  0x17   :  { %2063 = vmatpush3.xpose.msk.msra.mxu1 %vm284_vm0, %v61_v21  ;;  %2030 = vmatprep.subr.msk.mxu0 %vm284_vm0, %v44_v22  ;;  %v19_v62 = vld [vmem:[%s3408_s0 + $0x8] sm:$0xff]  ;;  %v34_v0 = vld [vmem:[%s3408_s0 + $0x80] sm:$0xff]  ;;  %v113_v4 = vld [vmem:[%s3408_s0 + $0x2f8] sm:$0xff] }
  0x18   :  { %2064 = vmatprep.subr.msk.mxu1 %vm284_vm0, %v76_v23  ;;  %v51_v63 = vld [vmem:[%s3408_s0 + $0x108] sm:$0xff]  ;;  %v66_v1 = vld [vmem:[%s3408_s0 + $0x180] sm:$0xff]  ;;  %v145_v5 = vld [vmem:[%s3408_s0 + $0x3f8] sm:$0xff] }
  0x19   :  { %v18_v2 = vld [vmem:[%s3408_s0] sm:$0xff]  ;;  %v97_v6 = vld [vmem:[%s3408_s0 + $0x278] sm:$0xff]  ;;  %v112_v8 = vld [vmem:[%s3408_s0 + $0x2f0] sm:$0xff] }
  0x1a   :  { %2031 = vmatpush3.xpose.msk.msra.mxu0 %vm284_vm0, %v28_v24  ;;  %v50_v3 = vld [vmem:[%s3408_s0 + $0x100] sm:$0xff]  ;;  %v129_v7 = vld [vmem:[%s3408_s0 + $0x378] sm:$0xff]  ;;  %v144_v9 = vld [vmem:[%s3408_s0 + $0x3f0] sm:$0xff] }
  0x1b   :  { %2065 = vmatpush3.xpose.msk.msra.mxu1 %vm284_vm0, %v60_v25  ;;  %2032 = vmatprep.subr.msk.mxu0 %vm284_vm0, %v43_v26 }
  0x1c   :  { %2066 = vmatprep.subr.msk.mxu1 %vm284_vm0, %v75_v27 }
  0x1e   :  { %2033 = vmatpush3.xpose.msk.msra.mxu0 %vm284_vm0, %v27_v29 }
  0x1f   :  { %2067 = vmatpush3.xpose.msk.msra.mxu1 %vm284_vm0, %v59_v30  ;;  %2034 = vmatprep.subr.msk.mxu0 %vm284_vm0, %v42_v31 }
  0x20   :  { %2068 = vmatprep.subr.msk.mxu1 %vm284_vm0, %v74_v32 }
  0x22   :  { %2035 = vmatpush3.xpose.msk.msra.mxu0 %vm284_vm0, %v26_v33 }
  0x23   :  { %2069 = vmatpush3.xpose.msk.msra.mxu1 %vm284_vm0, %v58_v34  ;;  %2036 = vmatprep.subr.msk.mxu0 %vm284_vm0, %v41_v35 }
  0x24   :  { %2070 = vmatprep.subr.msk.mxu1 %vm284_vm0, %v73_v36 }
  0x26   :  { %2037 = vmatpush3.xpose.msk.msra.mxu0 %vm284_vm0, %v25_v37 }
  0x27   :  { %2071 = vmatpush3.xpose.msk.msra.mxu1 %vm284_vm0, %v57_v38  ;;  %2038 = vmatprep.subr.msk.mxu0 %vm284_vm0, %v40_v39 }
  0x28   :  { %2072 = vmatprep.subr.msk.mxu1 %vm284_vm0, %v72_v40 }
  0x2a   :  { %2039 = vmatpush3.xpose.msk.msra.mxu0 %vm284_vm0, %v24_v41 }
  0x2b   :  { %2073 = vmatpush3.xpose.msk.msra.mxu1 %vm284_vm0, %v56_v42  ;;  %2040 = vmatprep.subr.msk.mxu0 %vm284_vm0, %v39_v43 }
  0x2c   :  { %2074 = vmatprep.subr.msk.mxu1 %vm284_vm0, %v71_v44 }
  0x2e   :  { %2041 = vmatpush3.xpose.msk.msra.mxu0 %vm284_vm0, %v23_v45 }
  0x2f   :  { %2075 = vmatpush3.xpose.msk.msra.mxu1 %vm284_vm0, %v55_v46  ;;  %2042 = vmatprep.subr.msk.mxu0 %vm284_vm0, %v38_v47 }
  0x30   :  { %2076 = vmatprep.subr.msk.mxu1 %vm284_vm0, %v70_v48 }
  0x32   :  { %2043 = vmatpush3.xpose.msk.msra.mxu0 %vm284_vm0, %v22_v49 }
  0x33   :  { %2077 = vmatpush3.xpose.msk.msra.mxu1 %vm284_vm0, %v54_v50  ;;  %2044 = vmatprep.subr.msk.mxu0 %vm284_vm0, %v37_v51 }
  0x34   :  { %2078 = vmatprep.subr.msk.mxu1 %vm284_vm0, %v69_v52 }
  0x36   :  { %2045 = vmatpush3.xpose.msk.msra.mxu0 %vm284_vm0, %v21_v54 }
  0x37   :  { %2079 = vmatpush3.xpose.msk.msra.mxu1 %vm284_vm0, %v53_v55  ;;  %2046 = vmatprep.subr.msk.mxu0 %vm284_vm0, %v36_v56 }
  0x38   :  { %2080 = vmatprep.subr.msk.mxu1 %vm284_vm0, %v68_v57 }
  0x3a   :  { %2047 = vmatpush3.xpose.msk.msra.mxu0 %vm284_vm0, %v20_v58 }
  0x3b   :  { %2081 = vmatpush3.xpose.msk.msra.mxu1 %vm284_vm0, %v52_v59  ;;  %2048 = vmatprep.subr.msk.mxu0 %vm284_vm0, %v35_v60 }
  0x3c   :  { %2082 = vmatprep.subr.msk.mxu1 %vm284_vm0, %v67_v61 }
  0x3e   :  { %2049 = vmatpush3.xpose.msk.msra.mxu0 %vm284_vm0, %v19_v62 }
  0x3f   :  { %2083 = vmatpush3.xpose.msk.msra.mxu1 %vm284_vm0, %v51_v63  ;;  %2050 = vmatprep.subr.msk.mxu0 %vm284_vm0, %v34_v0 }
  0x40   :  { %2084 = vmatprep.subr.msk.mxu1 %vm284_vm0, %v66_v1 }
  0x42   :  { %2051 = vmatpush3.xpose.msk.msra.mxu0 %vm284_vm0, %v18_v2 }
  0x43   :  { %2085 = vmatpush3.xpose.msk.msra.mxu1 %vm284_vm0, %v50_v3  ;;  %2088 = vmatprep.subr.msk.mxu0 %vm284_vm0, %v113_v4 }
  0x44   :  { %2122 = vmatprep.subr.msk.mxu1 %vm284_vm0, %v145_v5 }
  0x45   :  { %2053 = vmatmul.mubr.msk.f32.vlgmr.msra.gmra.mxu0 %vm284_vm0, %v2447_v28 }
  0x46   :  { %2087 = vmatmul.mubr.msk.f32.vlgmr.msra.gmra.mxu1 %vm284_vm0, %v2447_v28  ;;  %2089 = vmatpush3.xpose.msk.msra.mxu0 %vm284_vm0, %v97_v6 }
  0x47   :  { %2123 = vmatpush3.xpose.msk.msra.mxu1 %vm284_vm0, %v129_v7 }
  0x48   :  { %10 = vsyncpa [#allocation4], 0  ;;  %2090 = vmatprep.subr.msk.mxu0 %vm284_vm0, %v112_v8  ;;  %2124 = vmatprep.subr.msk.mxu1 %vm284_vm0, %v144_v9  ;;  %v96_v10 = vld [vmem:[%s3408_s0 + $0x270] sm:$0xff]  ;;  %v111_v12 = vld [vmem:[%s3408_s0 + $0x2e8] sm:$0xff] }
  0x49   :  { %v128_v11 = vld [vmem:[%s3408_s0 + $0x370] sm:$0xff]  ;;  %v143_v13 = vld [vmem:[%s3408_s0 + $0x3e8] sm:$0xff]  ;;  %2120 = vmatprep.mubr.msk.f32.mxu0 %vm284_vm0, %v2447_v28  ;;  %2154 = vmatprep.mubr.msk.f32.mxu1 %vm284_vm0, %v2447_v28  ;;  %v110_v16 = vld [vmem:[%s3408_s0 + $0x2e0] sm:$0xff] }
  0x4a   :  { %2091 = vmatpush3.xpose.msk.msra.mxu0 %vm284_vm0, %v96_v10  ;;  %v95_v14 = vld [vmem:[%s3408_s0 + $0x268] sm:$0xff]  ;;  %v142_v17 = vld [vmem:[%s3408_s0 + $0x3e0] sm:$0xff]  ;;  %v109_v20 = vld [vmem:[%s3408_s0 + $0x2d8] sm:$0xff] }
  0x4b   :  { %2125 = vmatpush3.xpose.msk.msra.mxu1 %vm284_vm0, %v128_v11  ;;  %2092 = vmatprep.subr.msk.mxu0 %vm284_vm0, %v111_v12  ;;  %v127_v15 = vld [vmem:[%s3408_s0 + $0x368] sm:$0xff]  ;;  %v94_v18 = vld [vmem:[%s3408_s0 + $0x260] sm:$0xff]  ;;  %v141_v21 = vld [vmem:[%s3408_s0 + $0x3d8] sm:$0xff] }
  0x4c   :  { %2126 = vmatprep.subr.msk.mxu1 %vm284_vm0, %v143_v13  ;;  %v126_v19 = vld [vmem:[%s3408_s0 + $0x360] sm:$0xff]  ;;  %v93_v22 = vld [vmem:[%s3408_s0 + $0x258] sm:$0xff]  ;;  %v108_v24 = vld [vmem:[%s3408_s0 + $0x2d0] sm:$0xff] }
  0x4d   :  { %v125_v23 = vld [vmem:[%s3408_s0 + $0x358] sm:$0xff]  ;;  %v140_v25 = vld [vmem:[%s3408_s0 + $0x3d0] sm:$0xff]  ;;  %v107_v29 = vld [vmem:[%s3408_s0 + $0x2c8] sm:$0xff] }
  0x4e   :  { %2093 = vmatpush3.xpose.msk.msra.mxu0 %vm284_vm0, %v95_v14  ;;  %v92_v26 = vld [vmem:[%s3408_s0 + $0x250] sm:$0xff]  ;;  %v139_v30 = vld [vmem:[%s3408_s0 + $0x3c8] sm:$0xff]  ;;  %v106_v33 = vld [vmem:[%s3408_s0 + $0x2c0] sm:$0xff] }
  0x4f   :  { %2127 = vmatpush3.xpose.msk.msra.mxu1 %vm284_vm0, %v127_v15  ;;  %2094 = vmatprep.subr.msk.mxu0 %vm284_vm0, %v110_v16  ;;  %v124_v27 = vld [vmem:[%s3408_s0 + $0x350] sm:$0xff]  ;;  %v91_v31 = vld [vmem:[%s3408_s0 + $0x248] sm:$0xff]  ;;  %v138_v34 = vld [vmem:[%s3408_s0 + $0x3c0] sm:$0xff] }
  0x50   :  { %2128 = vmatprep.subr.msk.mxu1 %vm284_vm0, %v142_v17  ;;  %v123_v32 = vld [vmem:[%s3408_s0 + $0x348] sm:$0xff]  ;;  %v90_v35 = vld [vmem:[%s3408_s0 + $0x240] sm:$0xff]  ;;  %v105_v37 = vld [vmem:[%s3408_s0 + $0x2b8] sm:$0xff] }
  0x51   :  { %v122_v36 = vld [vmem:[%s3408_s0 + $0x340] sm:$0xff]  ;;  %v137_v38 = vld [vmem:[%s3408_s0 + $0x3b8] sm:$0xff]  ;;  %v104_v41 = vld [vmem:[%s3408_s0 + $0x2b0] sm:$0xff] }
  0x52   :  { %2095 = vmatpush3.xpose.msk.msra.mxu0 %vm284_vm0, %v94_v18  ;;  %v89_v39 = vld [vmem:[%s3408_s0 + $0x238] sm:$0xff]  ;;  %v136_v42 = vld [vmem:[%s3408_s0 + $0x3b0] sm:$0xff]  ;;  %v103_v45 = vld [vmem:[%s3408_s0 + $0x2a8] sm:$0xff] }
  0x53   :  { %2129 = vmatpush3.xpose.msk.msra.mxu1 %vm284_vm0, %v126_v19  ;;  %2096 = vmatprep.subr.msk.mxu0 %vm284_vm0, %v109_v20  ;;  %v121_v40 = vld [vmem:[%s3408_s0 + $0x338] sm:$0xff]  ;;  %v88_v43 = vld [vmem:[%s3408_s0 + $0x230] sm:$0xff]  ;;  %v135_v46 = vld [vmem:[%s3408_s0 + $0x3a8] sm:$0xff] }
  0x54   :  { %2130 = vmatprep.subr.msk.mxu1 %vm284_vm0, %v141_v21  ;;  %v120_v44 = vld [vmem:[%s3408_s0 + $0x330] sm:$0xff]  ;;  %v87_v47 = vld [vmem:[%s3408_s0 + $0x228] sm:$0xff]  ;;  %v102_v49 = vld [vmem:[%s3408_s0 + $0x2a0] sm:$0xff] }
  0x55   :  { %v119_v48 = vld [vmem:[%s3408_s0 + $0x328] sm:$0xff]  ;;  %v134_v50 = vld [vmem:[%s3408_s0 + $0x3a0] sm:$0xff]  ;;  %v101_v53 = vld [vmem:[%s3408_s0 + $0x298] sm:$0xff] }
  0x56   :  { %2097 = vmatpush3.xpose.msk.msra.mxu0 %vm284_vm0, %v93_v22  ;;  %v86_v51 = vld [vmem:[%s3408_s0 + $0x220] sm:$0xff]  ;;  %v133_v54 = vld [vmem:[%s3408_s0 + $0x398] sm:$0xff]  ;;  %v100_v57 = vld [vmem:[%s3408_s0 + $0x290] sm:$0xff] }
  0x57   :  { %2131 = vmatpush3.xpose.msk.msra.mxu1 %vm284_vm0, %v125_v23  ;;  %2098 = vmatprep.subr.msk.mxu0 %vm284_vm0, %v108_v24  ;;  %v118_v52 = vld [vmem:[%s3408_s0 + $0x320] sm:$0xff]  ;;  %v85_v55 = vld [vmem:[%s3408_s0 + $0x218] sm:$0xff]  ;;  %v132_v58 = vld [vmem:[%s3408_s0 + $0x390] sm:$0xff] }
  0x58   :  { %2132 = vmatprep.subr.msk.mxu1 %vm284_vm0, %v140_v25  ;;  %v117_v56 = vld [vmem:[%s3408_s0 + $0x318] sm:$0xff]  ;;  %v84_v59 = vld [vmem:[%s3408_s0 + $0x210] sm:$0xff]  ;;  %v99_v61 = vld [vmem:[%s3408_s0 + $0x288] sm:$0xff] }
  0x59   :  { %v116_v60 = vld [vmem:[%s3408_s0 + $0x310] sm:$0xff]  ;;  %v131_v62 = vld [vmem:[%s3408_s0 + $0x388] sm:$0xff]  ;;  %v98_v1 = vld [vmem:[%s3408_s0 + $0x280] sm:$0xff] }
  0x5a   :  { %2099 = vmatpush3.xpose.msk.msra.mxu0 %vm284_vm0, %v92_v26  ;;  %v83_v63 = vld [vmem:[%s3408_s0 + $0x208] sm:$0xff]  ;;  %v130_v2 = vld [vmem:[%s3408_s0 + $0x380] sm:$0xff]  ;;  %v177_v5 = vld [vmem:[%s3408_s0 + $0x4f8] sm:$0xff] }
  0x5b   :  { %2133 = vmatpush3.xpose.msk.msra.mxu1 %vm284_vm0, %v124_v27  ;;  %2100 = vmatprep.subr.msk.mxu0 %vm284_vm0, %v107_v29  ;;  %v115_v0 = vld [vmem:[%s3408_s0 + $0x308] sm:$0xff]  ;;  %v82_v3 = vld [vmem:[%s3408_s0 + $0x200] sm:$0xff]  ;;  %v209_v6 = vld [vmem:[%s3408_s0 + $0x5f8] sm:$0xff] }
  0x5c   :  { %2134 = vmatprep.subr.msk.mxu1 %vm284_vm0, %v139_v30  ;;  %v114_v4 = vld [vmem:[%s3408_s0 + $0x300] sm:$0xff]  ;;  %v161_v7 = vld [vmem:[%s3408_s0 + $0x478] sm:$0xff]  ;;  %v176_v9 = vld [vmem:[%s3408_s0 + $0x4f0] sm:$0xff] }
  0x5d   :  { %v193_v8 = vld [vmem:[%s3408_s0 + $0x578] sm:$0xff]  ;;  %v208_v10 = vld [vmem:[%s3408_s0 + $0x5f0] sm:$0xff]  ;;  %v175_v13 = vld [vmem:[%s3408_s0 + $0x4e8] sm:$0xff] }
  0x5e   :  { %2101 = vmatpush3.xpose.msk.msra.mxu0 %vm284_vm0, %v91_v31  ;;  %v160_v11 = vld [vmem:[%s3408_s0 + $0x470] sm:$0xff]  ;;  %v207_v14 = vld [vmem:[%s3408_s0 + $0x5e8] sm:$0xff]  ;;  %v174_v17 = vld [vmem:[%s3408_s0 + $0x4e0] sm:$0xff] }
  0x5f   :  { %2135 = vmatpush3.xpose.msk.msra.mxu1 %vm284_vm0, %v123_v32  ;;  %2102 = vmatprep.subr.msk.mxu0 %vm284_vm0, %v106_v33  ;;  %v192_v12 = vld [vmem:[%s3408_s0 + $0x570] sm:$0xff]  ;;  %v159_v15 = vld [vmem:[%s3408_s0 + $0x468] sm:$0xff]  ;;  %v206_v18 = vld [vmem:[%s3408_s0 + $0x5e0] sm:$0xff] }
  0x60   :  { %2136 = vmatprep.subr.msk.mxu1 %vm284_vm0, %v138_v34  ;;  %v191_v16 = vld [vmem:[%s3408_s0 + $0x568] sm:$0xff]  ;;  %v158_v19 = vld [vmem:[%s3408_s0 + $0x460] sm:$0xff]  ;;  %v173_v21 = vld [vmem:[%s3408_s0 + $0x4d8] sm:$0xff] }
  0x61   :  { %v190_v20 = vld [vmem:[%s3408_s0 + $0x560] sm:$0xff]  ;;  %v205_v22 = vld [vmem:[%s3408_s0 + $0x5d8] sm:$0xff]  ;;  %v172_v25 = vld [vmem:[%s3408_s0 + $0x4d0] sm:$0xff] }
  0x62   :  { %2103 = vmatpush3.xpose.msk.msra.mxu0 %vm284_vm0, %v90_v35  ;;  %v157_v23 = vld [vmem:[%s3408_s0 + $0x458] sm:$0xff]  ;;  %v204_v26 = vld [vmem:[%s3408_s0 + $0x5d0] sm:$0xff]  ;;  %v171_v30 = vld [vmem:[%s3408_s0 + $0x4c8] sm:$0xff] }
  0x63   :  { %2137 = vmatpush3.xpose.msk.msra.mxu1 %vm284_vm0, %v122_v36  ;;  %2104 = vmatprep.subr.msk.mxu0 %vm284_vm0, %v105_v37  ;;  %v189_v24 = vld [vmem:[%s3408_s0 + $0x558] sm:$0xff]  ;;  %v156_v27 = vld [vmem:[%s3408_s0 + $0x450] sm:$0xff]  ;;  %v203_v31 = vld [vmem:[%s3408_s0 + $0x5c8] sm:$0xff] }
  0x64   :  { %2138 = vmatprep.subr.msk.mxu1 %vm284_vm0, %v137_v38  ;;  %v188_v29 = vld [vmem:[%s3408_s0 + $0x550] sm:$0xff]  ;;  %v155_v32 = vld [vmem:[%s3408_s0 + $0x448] sm:$0xff]  ;;  %v170_v34 = vld [vmem:[%s3408_s0 + $0x4c0] sm:$0xff] }
  0x65   :  { %v187_v33 = vld [vmem:[%s3408_s0 + $0x548] sm:$0xff]  ;;  %v202_v35 = vld [vmem:[%s3408_s0 + $0x5c0] sm:$0xff]  ;;  %v169_v38 = vld [vmem:[%s3408_s0 + $0x4b8] sm:$0xff] }
  0x66   :  { %2105 = vmatpush3.xpose.msk.msra.mxu0 %vm284_vm0, %v89_v39  ;;  %v154_v36 = vld [vmem:[%s3408_s0 + $0x440] sm:$0xff]  ;;  %v201_v39 = vld [vmem:[%s3408_s0 + $0x5b8] sm:$0xff] }
  0x67   :  { %2139 = vmatpush3.xpose.msk.msra.mxu1 %vm284_vm0, %v121_v40  ;;  %2106 = vmatprep.subr.msk.mxu0 %vm284_vm0, %v104_v41  ;;  %v186_v37 = vld [vmem:[%s3408_s0 + $0x540] sm:$0xff]  ;;  %v153_v40 = vld [vmem:[%s3408_s0 + $0x438] sm:$0xff] }
  0x68   :  { %2140 = vmatprep.subr.msk.mxu1 %vm284_vm0, %v136_v42  ;;  %v185_v41 = vld [vmem:[%s3408_s0 + $0x538] sm:$0xff]  ;;  %v168_v42 = vld [vmem:[%s3408_s0 + $0x4b0] sm:$0xff] }
  0x6a   :  { %2107 = vmatpush3.xpose.msk.msra.mxu0 %vm284_vm0, %v88_v43  ;;  %v200_v43 = vld [vmem:[%s3408_s0 + $0x5b0] sm:$0xff] }
  0x6b   :  { %2141 = vmatpush3.xpose.msk.msra.mxu1 %vm284_vm0, %v120_v44  ;;  %2108 = vmatprep.subr.msk.mxu0 %vm284_vm0, %v103_v45  ;;  %v152_v44 = vld [vmem:[%s3408_s0 + $0x430] sm:$0xff] }
  0x6c   :  { %2142 = vmatprep.subr.msk.mxu1 %vm284_vm0, %v135_v46  ;;  %v184_v45 = vld [vmem:[%s3408_s0 + $0x530] sm:$0xff]  ;;  %v167_v46 = vld [vmem:[%s3408_s0 + $0x4a8] sm:$0xff] }
  0x6e   :  { %2109 = vmatpush3.xpose.msk.msra.mxu0 %vm284_vm0, %v87_v47  ;;  %v199_v47 = vld [vmem:[%s3408_s0 + $0x5a8] sm:$0xff] }
  0x6f   :  { %2143 = vmatpush3.xpose.msk.msra.mxu1 %vm284_vm0, %v119_v48  ;;  %2110 = vmatprep.subr.msk.mxu0 %vm284_vm0, %v102_v49  ;;  %v151_v48 = vld [vmem:[%s3408_s0 + $0x428] sm:$0xff] }
  0x70   :  { %2144 = vmatprep.subr.msk.mxu1 %vm284_vm0, %v134_v50  ;;  %v183_v49 = vld [vmem:[%s3408_s0 + $0x528] sm:$0xff]  ;;  %v166_v50 = vld [vmem:[%s3408_s0 + $0x4a0] sm:$0xff] }
  0x72   :  { %2111 = vmatpush3.xpose.msk.msra.mxu0 %vm284_vm0, %v86_v51  ;;  %v198_v51 = vld [vmem:[%s3408_s0 + $0x5a0] sm:$0xff] }
  0x73   :  { %2145 = vmatpush3.xpose.msk.msra.mxu1 %vm284_vm0, %v118_v52  ;;  %2112 = vmatprep.subr.msk.mxu0 %vm284_vm0, %v101_v53  ;;  %v150_v52 = vld [vmem:[%s3408_s0 + $0x420] sm:$0xff] }
  0x74   :  { %2146 = vmatprep.subr.msk.mxu1 %vm284_vm0, %v133_v54  ;;  %v182_v53 = vld [vmem:[%s3408_s0 + $0x520] sm:$0xff]  ;;  %v165_v54 = vld [vmem:[%s3408_s0 + $0x498] sm:$0xff] }
  0x76   :  { %2113 = vmatpush3.xpose.msk.msra.mxu0 %vm284_vm0, %v85_v55  ;;  %v197_v55 = vld [vmem:[%s3408_s0 + $0x598] sm:$0xff] }
  0x77   :  { %2147 = vmatpush3.xpose.msk.msra.mxu1 %vm284_vm0, %v117_v56  ;;  %2114 = vmatprep.subr.msk.mxu0 %vm284_vm0, %v100_v57  ;;  %v149_v56 = vld [vmem:[%s3408_s0 + $0x418] sm:$0xff] }
  0x78   :  { %2148 = vmatprep.subr.msk.mxu1 %vm284_vm0, %v132_v58  ;;  %v181_v57 = vld [vmem:[%s3408_s0 + $0x518] sm:$0xff]  ;;  %v164_v58 = vld [vmem:[%s3408_s0 + $0x490] sm:$0xff] }
  0x7a   :  { %2115 = vmatpush3.xpose.msk.msra.mxu0 %vm284_vm0, %v84_v59  ;;  %v196_v59 = vld [vmem:[%s3408_s0 + $0x590] sm:$0xff] }
  0x7b   :  { %2149 = vmatpush3.xpose.msk.msra.mxu1 %vm284_vm0, %v116_v60  ;;  %2116 = vmatprep.subr.msk.mxu0 %vm284_vm0, %v99_v61  ;;  %v148_v60 = vld [vmem:[%s3408_s0 + $0x410] sm:$0xff] }
  0x7c   :  { %2150 = vmatprep.subr.msk.mxu1 %vm284_vm0, %v131_v62  ;;  %v180_v61 = vld [vmem:[%s3408_s0 + $0x510] sm:$0xff]  ;;  %v163_v62 = vld [vmem:[%s3408_s0 + $0x488] sm:$0xff] }
  0x7e   :  { %2117 = vmatpush3.xpose.msk.msra.mxu0 %vm284_vm0, %v83_v63  ;;  %v195_v63 = vld [vmem:[%s3408_s0 + $0x588] sm:$0xff] }
  0x7f   :  { %2151 = vmatpush3.xpose.msk.msra.mxu1 %vm284_vm0, %v115_v0  ;;  %2118 = vmatprep.subr.msk.mxu0 %vm284_vm0, %v98_v1  ;;  %v147_v0 = vld [vmem:[%s3408_s0 + $0x408] sm:$0xff] }
  0x80   :  { %2152 = vmatprep.subr.msk.mxu1 %vm284_vm0, %v130_v2  ;;  %v179_v1 = vld [vmem:[%s3408_s0 + $0x508] sm:$0xff]  ;;  %v162_v2 = vld [vmem:[%s3408_s0 + $0x480] sm:$0xff] }
  0x82   :  { %2119 = vmatpush3.xpose.msk.msra.mxu0 %vm284_vm0, %v82_v3  ;;  %v194_v3 = vld [vmem:[%s3408_s0 + $0x580] sm:$0xff] }
  0x83   :  { %2153 = vmatpush3.xpose.msk.msra.mxu1 %vm284_vm0, %v114_v4  ;;  %2156 = vmatprep.subr.msk.mxu0 %vm284_vm0, %v177_v5  ;;  %v146_v4 = vld [vmem:[%s3408_s0 + $0x400] sm:$0xff] }
  0x84   :  { %2190 = vmatprep.subr.msk.mxu1 %vm284_vm0, %v209_v6  ;;  %v178_v5 = vld [vmem:[%s3408_s0 + $0x500] sm:$0xff]  ;;  %v241_v6 = vld [vmem:[%s3408_s0 + $0x6f8] sm:$0xff] }
  0x85   :  { %2121 = vmatmul.mubr.msk.f32.vlgmr.msra.gmra.mxu0 %vm284_vm0, %v2447_v28 }
  0x86   :  { %2155 = vmatmul.mubr.msk.f32.vlgmr.msra.gmra.mxu1 %vm284_vm0, %v2447_v28  ;;  %2157 = vmatpush3.xpose.msk.msra.mxu0 %vm284_vm0, %v161_v7  ;;  %v273_v7 = vld [vmem:[%s3408_s0 + $0x7f8] sm:$0xff] }
  0x87   :  { %2191 = vmatpush3.xpose.msk.msra.mxu1 %vm284_vm0, %v193_v8  ;;  %2158 = vmatprep.subr.msk.mxu0 %vm284_vm0, %v176_v9  ;;  %v225_v8 = vld [vmem:[%s3408_s0 + $0x678] sm:$0xff] }
  0x88   :  { %2192 = vmatprep.subr.msk.mxu1 %vm284_vm0, %v208_v10  ;;  %2188 = vmatprep.mubr.msk.f32.mxu0 %vm284_vm0, %v2447_v28  ;;  %v257_v9 = vld [vmem:[%s3408_s0 + $0x778] sm:$0xff]  ;;  %v240_v10 = vld [vmem:[%s3408_s0 + $0x6f0] sm:$0xff] }
  0x89   :  { %2222 = vmatprep.mubr.msk.f32.mxu1 %vm284_vm0, %v2447_v28 }
  0x8a   :  { %2159 = vmatpush3.xpose.msk.msra.mxu0 %vm284_vm0, %v160_v11  ;;  %v272_v11 = vld [vmem:[%s3408_s0 + $0x7f0] sm:$0xff] }
  0x8b   :  { %2193 = vmatpush3.xpose.msk.msra.mxu1 %vm284_vm0, %v192_v12  ;;  %2160 = vmatprep.subr.msk.mxu0 %vm284_vm0, %v175_v13  ;;  %v224_v12 = vld [vmem:[%s3408_s0 + $0x670] sm:$0xff] }
  0x8c   :  { %2194 = vmatprep.subr.msk.mxu1 %vm284_vm0, %v207_v14  ;;  %v256_v13 = vld [vmem:[%s3408_s0 + $0x770] sm:$0xff]  ;;  %v239_v14 = vld [vmem:[%s3408_s0 + $0x6e8] sm:$0xff] }
  0x8e   :  { %2161 = vmatpush3.xpose.msk.msra.mxu0 %vm284_vm0, %v159_v15  ;;  %v271_v15 = vld [vmem:[%s3408_s0 + $0x7e8] sm:$0xff] }
  0x8f   :  { %2195 = vmatpush3.xpose.msk.msra.mxu1 %vm284_vm0, %v191_v16  ;;  %2162 = vmatprep.subr.msk.mxu0 %vm284_vm0, %v174_v17  ;;  %v223_v16 = vld [vmem:[%s3408_s0 + $0x668] sm:$0xff] }
  0x90   :  { %2196 = vmatprep.subr.msk.mxu1 %vm284_vm0, %v206_v18  ;;  %v255_v17 = vld [vmem:[%s3408_s0 + $0x768] sm:$0xff]  ;;  %v238_v18 = vld [vmem:[%s3408_s0 + $0x6e0] sm:$0xff] }
  0x92   :  { %2163 = vmatpush3.xpose.msk.msra.mxu0 %vm284_vm0, %v158_v19  ;;  %v270_v19 = vld [vmem:[%s3408_s0 + $0x7e0] sm:$0xff] }
  0x93   :  { %2197 = vmatpush3.xpose.msk.msra.mxu1 %vm284_vm0, %v190_v20  ;;  %2164 = vmatprep.subr.msk.mxu0 %vm284_vm0, %v173_v21  ;;  %v222_v20 = vld [vmem:[%s3408_s0 + $0x660] sm:$0xff] }
  0x94   :  { %2198 = vmatprep.subr.msk.mxu1 %vm284_vm0, %v205_v22  ;;  %v254_v21 = vld [vmem:[%s3408_s0 + $0x760] sm:$0xff]  ;;  %v237_v22 = vld [vmem:[%s3408_s0 + $0x6d8] sm:$0xff] }
  0x96   :  { %2165 = vmatpush3.xpose.msk.msra.mxu0 %vm284_vm0, %v157_v23  ;;  %v269_v23 = vld [vmem:[%s3408_s0 + $0x7d8] sm:$0xff] }
  0x97   :  { %2199 = vmatpush3.xpose.msk.msra.mxu1 %vm284_vm0, %v189_v24  ;;  %2166 = vmatprep.subr.msk.mxu0 %vm284_vm0, %v172_v25  ;;  %v221_v24 = vld [vmem:[%s3408_s0 + $0x658] sm:$0xff] }
  0x98   :  { %2200 = vmatprep.subr.msk.mxu1 %vm284_vm0, %v204_v26  ;;  %v253_v25 = vld [vmem:[%s3408_s0 + $0x758] sm:$0xff]  ;;  %v236_v26 = vld [vmem:[%s3408_s0 + $0x6d0] sm:$0xff] }
  0x9a   :  { %2167 = vmatpush3.xpose.msk.msra.mxu0 %vm284_vm0, %v156_v27  ;;  %v268_v27 = vld [vmem:[%s3408_s0 + $0x7d0] sm:$0xff] }
  0x9b   :  { %2201 = vmatpush3.xpose.msk.msra.mxu1 %vm284_vm0, %v188_v29  ;;  %2168 = vmatprep.subr.msk.mxu0 %vm284_vm0, %v171_v30  ;;  %v220_v29 = vld [vmem:[%s3408_s0 + $0x650] sm:$0xff] }
  0x9c   :  { %2202 = vmatprep.subr.msk.mxu1 %vm284_vm0, %v203_v31  ;;  %v252_v30 = vld [vmem:[%s3408_s0 + $0x750] sm:$0xff]  ;;  %v235_v31 = vld [vmem:[%s3408_s0 + $0x6c8] sm:$0xff] }
  0x9e   :  { %2169 = vmatpush3.xpose.msk.msra.mxu0 %vm284_vm0, %v155_v32  ;;  %v267_v32 = vld [vmem:[%s3408_s0 + $0x7c8] sm:$0xff] }
  0x9f   :  { %2203 = vmatpush3.xpose.msk.msra.mxu1 %vm284_vm0, %v187_v33  ;;  %2170 = vmatprep.subr.msk.mxu0 %vm284_vm0, %v170_v34  ;;  %v219_v33 = vld [vmem:[%s3408_s0 + $0x648] sm:$0xff] }
  0xa0   :  { %2204 = vmatprep.subr.msk.mxu1 %vm284_vm0, %v202_v35  ;;  %v251_v34 = vld [vmem:[%s3408_s0 + $0x748] sm:$0xff]  ;;  %v234_v35 = vld [vmem:[%s3408_s0 + $0x6c0] sm:$0xff] }
  0xa2   :  { %2171 = vmatpush3.xpose.msk.msra.mxu0 %vm284_vm0, %v154_v36  ;;  %v266_v36 = vld [vmem:[%s3408_s0 + $0x7c0] sm:$0xff] }
  0xa3   :  { %2205 = vmatpush3.xpose.msk.msra.mxu1 %vm284_vm0, %v186_v37  ;;  %2172 = vmatprep.subr.msk.mxu0 %vm284_vm0, %v169_v38  ;;  %v218_v37 = vld [vmem:[%s3408_s0 + $0x640] sm:$0xff] }
  0xa4   :  { %2206 = vmatprep.subr.msk.mxu1 %vm284_vm0, %v201_v39  ;;  %v250_v38 = vld [vmem:[%s3408_s0 + $0x740] sm:$0xff]  ;;  %v233_v39 = vld [vmem:[%s3408_s0 + $0x6b8] sm:$0xff] }
  0xa6   :  { %2173 = vmatpush3.xpose.msk.msra.mxu0 %vm284_vm0, %v153_v40  ;;  %v265_v40 = vld [vmem:[%s3408_s0 + $0x7b8] sm:$0xff] }
  0xa7   :  { %2207 = vmatpush3.xpose.msk.msra.mxu1 %vm284_vm0, %v185_v41  ;;  %2174 = vmatprep.subr.msk.mxu0 %vm284_vm0, %v168_v42  ;;  %v217_v41 = vld [vmem:[%s3408_s0 + $0x638] sm:$0xff] }
  0xa8   :  { %2208 = vmatprep.subr.msk.mxu1 %vm284_vm0, %v200_v43  ;;  %v249_v42 = vld [vmem:[%s3408_s0 + $0x738] sm:$0xff]  ;;  %v232_v43 = vld [vmem:[%s3408_s0 + $0x6b0] sm:$0xff] }
  0xaa   :  { %2175 = vmatpush3.xpose.msk.msra.mxu0 %vm284_vm0, %v152_v44  ;;  %v264_v44 = vld [vmem:[%s3408_s0 + $0x7b0] sm:$0xff] }
  0xab   :  { %2209 = vmatpush3.xpose.msk.msra.mxu1 %vm284_vm0, %v184_v45  ;;  %2176 = vmatprep.subr.msk.mxu0 %vm284_vm0, %v167_v46  ;;  %v216_v45 = vld [vmem:[%s3408_s0 + $0x630] sm:$0xff] }
  0xac   :  { %2210 = vmatprep.subr.msk.mxu1 %vm284_vm0, %v199_v47  ;;  %v248_v46 = vld [vmem:[%s3408_s0 + $0x730] sm:$0xff]  ;;  %v231_v47 = vld [vmem:[%s3408_s0 + $0x6a8] sm:$0xff] }
  0xae   :  { %2177 = vmatpush3.xpose.msk.msra.mxu0 %vm284_vm0, %v151_v48  ;;  %v263_v48 = vld [vmem:[%s3408_s0 + $0x7a8] sm:$0xff] }
  0xaf   :  { %2211 = vmatpush3.xpose.msk.msra.mxu1 %vm284_vm0, %v183_v49  ;;  %2178 = vmatprep.subr.msk.mxu0 %vm284_vm0, %v166_v50  ;;  %v215_v49 = vld [vmem:[%s3408_s0 + $0x628] sm:$0xff] }
  0xb0   :  { %2212 = vmatprep.subr.msk.mxu1 %vm284_vm0, %v198_v51  ;;  %v247_v50 = vld [vmem:[%s3408_s0 + $0x728] sm:$0xff]  ;;  %v230_v51 = vld [vmem:[%s3408_s0 + $0x6a0] sm:$0xff] }
  0xb2   :  { %2179 = vmatpush3.xpose.msk.msra.mxu0 %vm284_vm0, %v150_v52  ;;  %v262_v52 = vld [vmem:[%s3408_s0 + $0x7a0] sm:$0xff] }
  0xb3   :  { %2213 = vmatpush3.xpose.msk.msra.mxu1 %vm284_vm0, %v182_v53  ;;  %2180 = vmatprep.subr.msk.mxu0 %vm284_vm0, %v165_v54  ;;  %v214_v53 = vld [vmem:[%s3408_s0 + $0x620] sm:$0xff] }
  0xb4   :  { %2214 = vmatprep.subr.msk.mxu1 %vm284_vm0, %v197_v55  ;;  %v246_v54 = vld [vmem:[%s3408_s0 + $0x720] sm:$0xff]  ;;  %v229_v55 = vld [vmem:[%s3408_s0 + $0x698] sm:$0xff] }
  0xb6   :  { %2181 = vmatpush3.xpose.msk.msra.mxu0 %vm284_vm0, %v149_v56  ;;  %v261_v56 = vld [vmem:[%s3408_s0 + $0x798] sm:$0xff] }
  0xb7   :  { %2215 = vmatpush3.xpose.msk.msra.mxu1 %vm284_vm0, %v181_v57  ;;  %2182 = vmatprep.subr.msk.mxu0 %vm284_vm0, %v164_v58  ;;  %v213_v57 = vld [vmem:[%s3408_s0 + $0x618] sm:$0xff] }
  0xb8   :  { %2216 = vmatprep.subr.msk.mxu1 %vm284_vm0, %v196_v59  ;;  %v245_v58 = vld [vmem:[%s3408_s0 + $0x718] sm:$0xff]  ;;  %v228_v59 = vld [vmem:[%s3408_s0 + $0x690] sm:$0xff] }
  0xba   :  { %2183 = vmatpush3.xpose.msk.msra.mxu0 %vm284_vm0, %v148_v60  ;;  %v260_v60 = vld [vmem:[%s3408_s0 + $0x790] sm:$0xff] }
  0xbb   :  { %2217 = vmatpush3.xpose.msk.msra.mxu1 %vm284_vm0, %v180_v61  ;;  %2184 = vmatprep.subr.msk.mxu0 %vm284_vm0, %v163_v62  ;;  %v212_v61 = vld [vmem:[%s3408_s0 + $0x610] sm:$0xff] }
  0xbc   :  { %2218 = vmatprep.subr.msk.mxu1 %vm284_vm0, %v195_v63  ;;  %v244_v62 = vld [vmem:[%s3408_s0 + $0x710] sm:$0xff]  ;;  %v227_v63 = vld [vmem:[%s3408_s0 + $0x688] sm:$0xff] }
  0xbe   :  { %2185 = vmatpush3.xpose.msk.msra.mxu0 %vm284_vm0, %v147_v0  ;;  %v259_v0 = vld [vmem:[%s3408_s0 + $0x788] sm:$0xff] }
  0xbf   :  { %2219 = vmatpush3.xpose.msk.msra.mxu1 %vm284_vm0, %v179_v1  ;;  %2186 = vmatprep.subr.msk.mxu0 %vm284_vm0, %v162_v2  ;;  %v211_v1 = vld [vmem:[%s3408_s0 + $0x608] sm:$0xff] }
  0xc0   :  { %2220 = vmatprep.subr.msk.mxu1 %vm284_vm0, %v194_v3  ;;  %v243_v2 = vld [vmem:[%s3408_s0 + $0x708] sm:$0xff]  ;;  %v226_v3 = vld [vmem:[%s3408_s0 + $0x680] sm:$0xff] }
  0xc2   :  { %2187 = vmatpush3.xpose.msk.msra.mxu0 %vm284_vm0, %v146_v4  ;;  %v258_v4 = vld [vmem:[%s3408_s0 + $0x780] sm:$0xff] }
  0xc3   :  { %2221 = vmatpush3.xpose.msk.msra.mxu1 %vm284_vm0, %v178_v5  ;;  %2224 = vmatprep.subr.msk.mxu0 %vm284_vm0, %v241_v6  ;;  %v210_v5 = vld [vmem:[%s3408_s0 + $0x600] sm:$0xff] }
  0xc4   :  { %2258 = vmatprep.subr.msk.mxu1 %vm284_vm0, %v273_v7  ;;  %v242_v6 = vld [vmem:[%s3408_s0 + $0x700] sm:$0xff]  ;;  %v280_v7 = vlaneseq  ;;  %s2320_s0 = smov [#allocation3]  }
  0xc5   :  { %2189 = vmatmul.mubr.msk.f32.vlgmr.msra.gmra.mxu0 %vm284_vm0, %v2447_v28  ;;  %s1748_s8 = sshll.u32 %s2320_s0, 4  ;;  %s1749_s8 = int_to_ptr.vmem [resolvable:$true] %s1748_s8 }
  0xc6   :  { %2223 = vmatmul.mubr.msk.f32.vlgmr.msra.gmra.mxu1 %vm284_vm0, %v2447_v28  ;;  %2225 = vmatpush3.xpose.msk.msra.mxu0 %vm284_vm0, %v225_v8  ;;  %v281_v8 = vshrl.u32 %v280_v7, 7  ;;  %s2296_s9 = scalar_lea.vmem %s1749_s8, 256  ;;  %p2301_p1 = scmp.lt.s32.totalorder %s1749_s8, %s1749_s8 }
  0xc7   :  { %2259 = vmatpush3.xpose.msk.msra.mxu1 %vm284_vm0, %v257_v9  ;;  %2226 = vmatprep.subr.msk.mxu0 %vm284_vm0, %v240_v10  ;;  %v278_v10 = vpop.permute.xlu0 %277  ;;  %p2297_p0 = scmp.ne.s32.totalorder %s1749_s8, %s2296_s9  ;;  %p2302_p2 = scmp.lt.s32.totalorder %s2296_s9, %s2296_s9 }
  0xc8   :  { %2260 = vmatprep.subr.msk.mxu1 %vm284_vm0, %v272_v11  ;;  %2256 = vmatprep.mubr.msk.f32.mxu0 %vm284_vm0, %v2447_v28  ;;  %v282_v9 = vsub.s32 0, %v281_v8 }
  0xc9   :  { %2290 = vmatprep.mubr.msk.f32.mxu1 %vm284_vm0, %v2447_v28  ;;  %p2303_p3 = por %p2302_p2, %p2301_p1 }
  0xca   :  { %2227 = vmatpush3.xpose.msk.msra.mxu0 %vm284_vm0, %v224_v12 }
  0xcb   :  { %2261 = vmatpush3.xpose.msk.msra.mxu1 %vm284_vm0, %v256_v13  ;;  %2228 = vmatprep.subr.msk.mxu0 %vm284_vm0, %v239_v14  ;;  %v2319_v13 = vmov 1966171168   ;;  %p2304_p4 = pnand %p2303_p3, %p2297_p0 }
  0xcc   :  { %2262 = vmatprep.subr.msk.mxu1 %vm284_vm0, %v271_v15  ;;  %v1645_v14 = vunpack.c.l.s4 %v2319_v13  ;;  %v283_v15 = vrot.slane %v278_v10, %v282_v9 }
  0xce   :  { %2229 = vmatpush3.xpose.msk.msra.mxu0 %vm284_vm0, %v223_v16 }
  0xcf   :  { %2263 = vmatpush3.xpose.msk.msra.mxu1 %vm284_vm0, %v255_v17  ;;  %2230 = vmatprep.subr.msk.mxu0 %vm284_vm0, %v238_v18  ;;  %v1646_v18 = vunpack.c.0.s8 %v1645_v14 }
  0xd0   :  { %2264 = vmatprep.subr.msk.mxu1 %vm284_vm0, %v270_v19 }
  0xd2   :  { %2231 = vmatpush3.xpose.msk.msra.mxu0 %vm284_vm0, %v222_v20 }
  0xd3   :  { %2265 = vmatpush3.xpose.msk.msra.mxu1 %vm284_vm0, %v254_v21  ;;  %2232 = vmatprep.subr.msk.mxu0 %vm284_vm0, %v237_v22 }
  0xd4   :  { %2266 = vmatprep.subr.msk.mxu1 %vm284_vm0, %v269_v23 }
  0xd6   :  { %2233 = vmatpush3.xpose.msk.msra.mxu0 %vm284_vm0, %v221_v24  ;;  %v1649_v24 = vsub.s32 %v1646_v18, %v281_v8 }
  0xd7   :  { %2267 = vmatpush3.xpose.msk.msra.mxu1 %vm284_vm0, %v253_v25  ;;  %2234 = vmatprep.subr.msk.mxu0 %vm284_vm0, %v236_v26 }
  0xd8   :  { %2268 = vmatprep.subr.msk.mxu1 %vm284_vm0, %v268_v27 }
  0xda   :  { %2235 = vmatpush3.xpose.msk.msra.mxu0 %vm284_vm0, %v220_v29 }
  0xdb   :  { %2269 = vmatpush3.xpose.msk.msra.mxu1 %vm284_vm0, %v252_v30  ;;  %2236 = vmatprep.subr.msk.mxu0 %vm284_vm0, %v235_v31 }
  0xdc   :  { %2270 = vmatprep.subr.msk.mxu1 %vm284_vm0, %v267_v32 }
  0xde   :  { %2237 = vmatpush3.xpose.msk.msra.mxu0 %vm284_vm0, %v219_v33 }
  0xdf   :  { %2271 = vmatpush3.xpose.msk.msra.mxu1 %vm284_vm0, %v251_v34  ;;  %2238 = vmatprep.subr.msk.mxu0 %vm284_vm0, %v234_v35 }
  0xe0   :  { %2272 = vmatprep.subr.msk.mxu1 %vm284_vm0, %v266_v36 }
  0xe2   :  { %2239 = vmatpush3.xpose.msk.msra.mxu0 %vm284_vm0, %v218_v37 }
  0xe3   :  { %2273 = vmatpush3.xpose.msk.msra.mxu1 %vm284_vm0, %v250_v38  ;;  %2240 = vmatprep.subr.msk.mxu0 %vm284_vm0, %v233_v39 }
  0xe4   :  { %2274 = vmatprep.subr.msk.mxu1 %vm284_vm0, %v265_v40 }
  0xe6   :  { %2241 = vmatpush3.xpose.msk.msra.mxu0 %vm284_vm0, %v217_v41 }
  0xe7   :  { %2275 = vmatpush3.xpose.msk.msra.mxu1 %vm284_vm0, %v249_v42  ;;  %2242 = vmatprep.subr.msk.mxu0 %vm284_vm0, %v232_v43 }
  0xe8   :  { %2276 = vmatprep.subr.msk.mxu1 %vm284_vm0, %v264_v44 }
  0xea   :  { %2243 = vmatpush3.xpose.msk.msra.mxu0 %vm284_vm0, %v216_v45 }
  0xeb   :  { %2277 = vmatpush3.xpose.msk.msra.mxu1 %vm284_vm0, %v248_v46  ;;  %2244 = vmatprep.subr.msk.mxu0 %vm284_vm0, %v231_v47 }
  0xec   :  { %2278 = vmatprep.subr.msk.mxu1 %vm284_vm0, %v263_v48 }
  0xee   :  { %2245 = vmatpush3.xpose.msk.msra.mxu0 %vm284_vm0, %v215_v49 }
  0xef   :  { %2279 = vmatpush3.xpose.msk.msra.mxu1 %vm284_vm0, %v247_v50  ;;  %2246 = vmatprep.subr.msk.mxu0 %vm284_vm0, %v230_v51 }
  0xf0   :  { %2280 = vmatprep.subr.msk.mxu1 %vm284_vm0, %v262_v52 }
  0xf2   :  { %2247 = vmatpush3.xpose.msk.msra.mxu0 %vm284_vm0, %v214_v53 }
  0xf3   :  { %2281 = vmatpush3.xpose.msk.msra.mxu1 %vm284_vm0, %v246_v54  ;;  %2248 = vmatprep.subr.msk.mxu0 %vm284_vm0, %v229_v55 }
  0xf4   :  { %2282 = vmatprep.subr.msk.mxu1 %vm284_vm0, %v261_v56 }
  0xf6   :  { %2249 = vmatpush3.xpose.msk.msra.mxu0 %vm284_vm0, %v213_v57 }
  0xf7   :  { %2283 = vmatpush3.xpose.msk.msra.mxu1 %vm284_vm0, %v245_v58  ;;  %2250 = vmatprep.subr.msk.mxu0 %vm284_vm0, %v228_v59 }
  0xf8   :  { %2284 = vmatprep.subr.msk.mxu1 %vm284_vm0, %v260_v60 }
  0xfa   :  { %2251 = vmatpush3.xpose.msk.msra.mxu0 %vm284_vm0, %v212_v61 }
  0xfb   :  { %2285 = vmatpush3.xpose.msk.msra.mxu1 %vm284_vm0, %v244_v62  ;;  %2252 = vmatprep.subr.msk.mxu0 %vm284_vm0, %v227_v63 }
  0xfc   :  { %2286 = vmatprep.subr.msk.mxu1 %vm284_vm0, %v259_v0 }
  0xfe   :  { %2253 = vmatpush3.xpose.msk.msra.mxu0 %vm284_vm0, %v211_v1 }
  0xff   :  { %2287 = vmatpush3.xpose.msk.msra.mxu1 %vm284_vm0, %v243_v2  ;;  %2254 = vmatprep.subr.msk.mxu0 %vm284_vm0, %v226_v3 }
 0x100   :  { %2288 = vmatprep.subr.msk.mxu1 %vm284_vm0, %v258_v4 }
 0x102   :  { %2255 = vmatpush3.xpose.msk.msra.mxu0 %vm284_vm0, %v210_v5 }
 0x103   :  { %2289 = vmatpush3.xpose.msk.msra.mxu1 %vm284_vm0, %v242_v6 }
 0x105   :  { %2257 = vmatmul.mubr.msk.f32.vlgmr.msra.gmra.mxu0 %vm284_vm0, %v2447_v28  ;;  %v1122_v11 = vpop.f32.mrf.mxu0 }
 0x106   :  { %2291 = vmatmul.mubr.msk.f32.vlgmr.msra.gmra.mxu1 %vm284_vm0, %v2447_v28  ;;  %v1193_v12 = vpop.f32.mrf.mxu1  ;;  %v1123_v19 = vadd.f32 %v1122_v11, %v283_v15 }
 0x107   :  { %v1124_v16 = vpop.f32.mrf.mxu0  ;;  %v1194_v20 = vadd.f32 %v1193_v12, %v283_v15 }
 0x108   :  { %v1195_v17 = vpop.f32.mrf.mxu1  ;;  %v1125_v21 = vadd.f32 %v1124_v16, %v283_v15 }
 0x109   :  { %v1196_v22 = vadd.f32 %v1195_v17, %v283_v15 }
 0x10a   :  { %v1640_v23 = vcombine.low %v1123_v19, %v1125_v21 }
 0x10b   :  { %v1641_v25 = vcombine.low %v1194_v20, %v1196_v22 }
 0x10c   :  { %v1650_v32 = vrot.slane %v1640_v23, %v1649_v24 }
 0x10d   :  { %v1657_v33 = vrot.slane %v1641_v25, %v1649_v24 }
 0x10f   :  { %v1672_v38 = vcombine.low %v1650_v32, %v1657_v33 }
 0x111   :  { %v1680_v42 = vrot.slane %v1672_v38, %v1649_v24 }
 0x145   :  { %v1264_v28 = vpop.f32.mrf.mxu0 }
 0x146   :  { %v1335_v26 = vpop.f32.mrf.mxu1  ;;  %v1265_v27 = vadd.f32 %v1264_v28, %v283_v15 }
 0x147   :  { %v1336_v29 = vadd.f32 %v1335_v26, %v283_v15  ;;  %v1266_v30 = vpop.f32.mrf.mxu0 }
 0x148   :  { %v1337_v31 = vpop.f32.mrf.mxu1  ;;  %v1267_v34 = vadd.f32 %v1266_v30, %v283_v15 }
 0x149   :  { %v1338_v35 = vadd.f32 %v1337_v31, %v283_v15 }
 0x14a   :  { %v1642_v36 = vcombine.low %v1265_v27, %v1267_v34 }
 0x14b   :  { %v1643_v37 = vcombine.low %v1336_v29, %v1338_v35 }
 0x14c   :  { %v1664_v39 = vrot.slane %v1642_v36, %v1649_v24 }
 0x14d   :  { %v1671_v40 = vrot.slane %v1643_v37, %v1649_v24 }
 0x14f   :  { %v1673_v41 = vcombine.low %v1664_v39, %v1671_v40 }
 0x151   :  { %v1687_v43 = vrot.slane %v1673_v41, %v1649_v24 }
 0x153   :  { %v1688_v44 = vcombine.low %v1680_v42, %v1687_v43 }
 0x155   :  { %1740 = vst [vmem:[#allocation3] sm:$0xff] %v1688_v44 }
 0x185   :  { %v1406_v45 = vpop.f32.mrf.mxu0 }
 0x186   :  { %v1477_v46 = vpop.f32.mrf.mxu1  ;;  %v1407_v49 = vadd.f32 %v1406_v45, %v283_v15 }
 0x187   :  { %v1408_v47 = vpop.f32.mrf.mxu0  ;;  %v1478_v50 = vadd.f32 %v1477_v46, %v283_v15 }
 0x188   :  { %v1479_v48 = vpop.f32.mrf.mxu1  ;;  %v1409_v51 = vadd.f32 %v1408_v47, %v283_v15 }
 0x189   :  { %v1480_v52 = vadd.f32 %v1479_v48, %v283_v15 }
 0x18a   :  { %v1689_v53 = vcombine.low %v1407_v49, %v1409_v51 }
 0x18b   :  { %v1690_v54 = vcombine.low %v1478_v50, %v1480_v52 }
 0x18c   :  { %v1699_v57 = vrot.slane %v1689_v53, %v1649_v24 }
 0x18d   :  { %v1706_v58 = vrot.slane %v1690_v54, %v1649_v24 }
 0x18f   :  { %v1721_v3 = vcombine.low %v1699_v57, %v1706_v58 }
 0x191   :  { %v1729_v7 = vrot.slane %v1721_v3, %v1649_v24 }
 0x1c5   :  { %v1548_v55 = vpop.f32.mrf.mxu0 }
 0x1c6   :  { %v1619_v56 = vpop.f32.mrf.mxu1  ;;  %v1549_v61 = vadd.f32 %v1548_v55, %v283_v15 }
 0x1c7   :  { %v1550_v59 = vpop.f32.mrf.mxu0  ;;  %v1620_v62 = vadd.f32 %v1619_v56, %v283_v15 }
 0x1c8   :  { %v1621_v60 = vpop.f32.mrf.mxu1  ;;  %v1551_v63 = vadd.f32 %v1550_v59, %v283_v15 }
 0x1c9   :  { %v1622_v0 = vadd.f32 %v1621_v60, %v283_v15 }
 0x1ca   :  { %v1691_v1 = vcombine.low %v1549_v61, %v1551_v63 }
 0x1cb   :  { %v1692_v2 = vcombine.low %v1620_v62, %v1622_v0 }
 0x1cc   :  { %v1713_v4 = vrot.slane %v1691_v1, %v1649_v24 }
 0x1cd   :  { %v1720_v5 = vrot.slane %v1692_v2, %v1649_v24 }
 0x1cf   :  { %v1722_v6 = vcombine.low %v1713_v4, %v1720_v5 }
 0x1d1   :  { %v1736_v8 = vrot.slane %v1722_v6, %v1649_v24 }
 0x1d3   :  { %v1737_v9 = vcombine.low %v1729_v7, %v1736_v8 }
 0x1d5   :  { %1741 = vst [vmem:[#allocation3 + $0x8] sm:$0xff] %v1737_v9 }
 0x1d6   :  { %2307 = shalt.err (!%p2304_p4)
}
 0x1d7   :  { %1751 = dma.vmem_to_hbm [thread:$0]  %s1749_s8, 256, %s3411_s3, [#allocation4]  }
 0x1d8   :  { %2316 = dma.done.wait [#allocation4], 256  }
 0x1d9   :  { %2317 = vsyncadd [#allocation4], 4294967040 }
 0x1da   :  { %1755 = vsyncpa [#allocation4], 1 }

</bundles_post_ra>
